<compile_context>
chip_gen: v7x
topology: tpu7x:2x2x1
jax: 0.10.0
libtpu: 0.0.40
codegen_flags: <defaults>
</compile_context>

<pallas_src>
import functools
import random

import jax
import jax.numpy as jnp
from jax.experimental import pallas as pl
from jax.experimental.pallas import tpu as pltpu


_LANE = 128       # lane width: pad feature dims to multiples of this
_SUBLANE = 8      # f32 sublane granularity for batch tiles / partial slabs
_TB_MAX = 1024    # batch-tile rows cap (review: 512 -> 1024+ amortizes per-step overhead)

_LOSS_CODES = {"mse": 0, "mae": 1}


def _round_up(n, m):
    return (n + m - 1) // m * m


@functools.lru_cache(maxsize=None)
def _vmem_limit_bytes():
    # Generation-aware scoped-VMEM limit: ~3/4 of physical, capped at 96 MiB.
    #   v5e/v6e: 128 MiB physical -> 96 MiB limit; v7x: 64 MiB -> 48 MiB.
    # Safe fallback (48 MiB) if the hardware query is unavailable.
    cap = 64 * 1024 * 1024
    try:
        cap = int(pltpu.get_tpu_info().vmem_capacity_bytes)
    except Exception:
        pass
    return min(96 * 1024 * 1024, (cap * 3) // 4)


def _pick_tb(d_in_p, d_out_p, vmem_limit):
    # Per-row VMEM bytes across double-buffered tiles:
    #   x (bf16, x2) + labels (bf16, x2) + recv out (f32, x2)
    per_row = 2 * (2 * d_in_p + 2 * d_out_p + 4 * d_out_p)
    tb = min(_TB_MAX, (vmem_limit // 2) // max(per_row, 1))  # half left for weights/scratch
    return max(_SUBLANE, (tb // _SUBLANE) * _SUBLANE)


# ----------------------------------------------------------------------------
# Pallas kernel: fused sender -> receiver -> per-tile partial loss
# ----------------------------------------------------------------------------
def _game_kernel(loss_kind_ref, x_ref, ws_ref, wr_ref, y_ref, recv_ref, part_ref):
    # sender: message = tanh(x @ W_s)
    #   bf16 MXU matmul, f32 accumulate; one pack to bf16, tanh on packed vregs
    #   (bf16 EUP on v6e/v7x), result feeds the second MXU matmul directly.
    msg = jnp.tanh(
        jnp.dot(x_ref[...], ws_ref[...],
                preferred_element_type=jnp.float32).astype(jnp.bfloat16)
    )
    # receiver: recv = msg @ W_r   (bf16 x bf16 -> f32)
    recv = jnp.dot(msg, wr_ref[...], preferred_element_type=jnp.float32)
    recv_ref[...] = recv.astype(recv_ref.dtype)

    # loss: zero-padded batch rows / output columns contribute exactly 0 to the
    # sum (recv and labels are both 0 there: weights are zero-padded and
    # tanh(0)=0), so partial sums are unbiased; the mean divisor (unpadded
    # element count) is applied once in the wrapper.
    diff = recv - y_ref[...].astype(jnp.float32)
    tb, d = diff.shape

    def _partial_slab(v):
        # reduce TB rows to a sublane/lane aligned (8, D_out_p) slab; the final
        # cross-slab + cross-lane reduce happens once outside the kernel.
        return jnp.sum(v.reshape(tb // _SUBLANE, _SUBLANE, d), axis=0)

    is_mse = loss_kind_ref[0] == 0

    @pl.when(is_mse)
    def _mse():
        part_ref[...] = _partial_slab(diff * diff)

    @pl.when(jnp.logical_not(is_mse))
    def _mae():
        part_ref[...] = _partial_slab(jnp.abs(diff))


@jax.jit
def _fused_game(loss_code, x, ws_p, wr_p, labels):
    """x:[B,D_in] f32, labels:[B,D_out] f32, ws_p/wr_p: pre-padded bf16 weights."""
    B, D_in = x.shape
    D_out = labels.shape[1]
    D_in_p, D_msg_p = ws_p.shape
    D_out_p = wr_p.shape[1]

    vmem_limit = _vmem_limit_bytes()
    B_p = _round_up(B, _SUBLANE)
    TB = min(B_p, _pick_tb(D_in_p, D_out_p, vmem_limit))
    B_p = _round_up(B_p, TB)
    n_tiles = B_p // TB

    # Only the per-call activations are padded/cast here; weights were padded
    # once at population-construction time (no per-call pad/convert traffic).
    x_p = jnp.pad(x, ((0, B_p - B), (0, D_in_p - D_in))).astype(jnp.bfloat16)
    y_p = jnp.pad(labels, ((0, B_p - B), (0, D_out_p - D_out))).astype(jnp.bfloat16)

    cost = pl.CostEstimate(
        flops=2 * B_p * D_in_p * D_msg_p + 2 * B_p * D_msg_p * D_out_p,
        transcendentals=B_p * D_msg_p,
        bytes_accessed=(x_p.size * 2 + ws_p.size * 2 + wr_p.size * 2
                        + y_p.size * 2 + B_p * D_out_p * 4
                        + n_tiles * _SUBLANE * D_out_p * 4),
    )

    recv_pad, partials = pl.pallas_call(
        _game_kernel,
        out_shape=(
            jax.ShapeDtypeStruct((B_p, D_out_p), jnp.float32),
            jax.ShapeDtypeStruct((n_tiles * _SUBLANE, D_out_p), jnp.float32),
        ),
        grid_spec=pltpu.PrefetchScalarGridSpec(
            num_scalar_prefetch=1,          # loss_kind code lands in SMEM
            grid=(n_tiles,),                # tiled over batch -> pipelined DMA
            in_specs=[
                pl.BlockSpec((TB, D_in_p), lambda i, lk: (i, 0)),        # x tile
                pl.BlockSpec((D_in_p, D_msg_p), lambda i, lk: (0, 0)),   # W_s (resident)
                pl.BlockSpec((D_msg_p, D_out_p), lambda i, lk: (0, 0)),  # W_r (resident)
                pl.BlockSpec((TB, D_out_p), lambda i, lk: (i, 0)),       # labels tile
            ],
            out_specs=(
                pl.BlockSpec((TB, D_out_p), lambda i, lk: (i, 0)),            # recv tile
                pl.BlockSpec((_SUBLANE, D_out_p), lambda i, lk: (i, 0)),      # partial loss slab
            ),
        ),
        compiler_params=pltpu.CompilerParams(
            # no cross-step accumulator anymore -> batch axis can shard across
            # v7x's two TensorCores.
            dimension_semantics=("parallel",),
            vmem_limit_bytes=vmem_limit,
        ),
        cost_estimate=cost,
    )(loss_code, x_p, ws_p, wr_p, y_p)

    inv_count = 1.0 / float(B * D_out)
    loss = jnp.sum(partials) * inv_count
    return loss, recv_pad[:B, :D_out]


def run_game(sender_w, receiver_w, loss_kind, x, labels):
    """One forward pass of the sampled game, fused into a single Pallas kernel.

    sender_w / receiver_w are the pre-padded bf16 weights produced by
    make_population (lane-dense, zero-padded).
    """
    B, D_in = x.shape
    D_out = labels.shape[1]
    assert sender_w.shape[0] == _round_up(D_in, _LANE)
    assert receiver_w.shape[0] == sender_w.shape[1]
    assert receiver_w.shape[1] == _round_up(D_out, _LANE)

    code = jnp.array([_LOSS_CODES[loss_kind]], dtype=jnp.int32)
    return _fused_game(code, x, sender_w, receiver_w, labels)


# ----------------------------------------------------------------------------
# Population + deterministic sampler (glue, plain Python/JAX)
# ----------------------------------------------------------------------------
class PopulationGame:
    def __init__(self, game, agents_loss_sampler):
        self.game = game
        self.agents_loss_sampler = agents_loss_sampler

    def __call__(self, *args, **kwargs):
        sender, receiver, loss = self.agents_loss_sampler()
        return self.game(sender, receiver, loss, *args, **kwargs)


def _pad_weight(w):
    """Pad a [R, C] f32 weight to lane-dense [R_p, C_p] bf16 (zero padding)."""
    r, c = w.shape
    r_p, c_p = _round_up(r, _LANE), _round_up(c, _LANE)
    return jnp.pad(w, ((0, r_p - r), (0, c_p - c))).astype(jnp.bfloat16)


def make_population(key, n_senders, n_receivers, d_in, d_msg, d_out):
    # Weights are padded + cast to bf16 ONCE here (not per call).
    ks = jax.random.split(key, n_senders + n_receivers)
    senders = [
        _pad_weight(jax.random.normal(ks[i], (d_in, d_msg), jnp.float32) * 0.1)
        for i in range(n_senders)
    ]
    receivers = [
        _pad_weight(jax.random.normal(ks[n_senders + j], (d_msg, d_out), jnp.float32) * 0.1)
        for j in range(n_receivers)
    ]
    losses = ["mse", "mae"]
    return senders, receivers, losses


def make_sampler(senders, receivers, losses, seed=0):
    rng = random.Random(seed)  # deterministic sampling, mirrors the PyTorch sampler

    def sampler():
        s = senders[rng.randrange(len(senders))]
        r = receivers[rng.randrange(len(receivers))]
        l = losses[rng.randrange(len(losses))]
        return s, r, l

    return sampler


# ----------------------------------------------------------------------------
if __name__ == "__main__":
    B, D_in, D_msg, D_out = 8, 32, 64, 32

    key = jax.random.PRNGKey(0)
    k_pop, k_x, k_y = jax.random.split(key, 3)

    senders, receivers, losses = make_population(
        k_pop, n_senders=3, n_receivers=3, d_in=D_in, d_msg=D_msg, d_out=D_out
    )
    sampler = make_sampler(senders, receivers, losses, seed=0)

    population_game = PopulationGame(run_game, sampler)

    x = jax.random.normal(k_x, (B, D_in), jnp.float32)
    labels = jax.random.normal(k_y, (B, D_out), jnp.float32)

    loss, recv_out = population_game(x, labels)
    jax.block_until_ready((loss, recv_out))

    assert recv_out.shape == (B, D_out)
    assert loss.shape == ()
    assert bool(jnp.isfinite(loss))
    assert bool(jnp.all(jnp.isfinite(recv_out)))

    # second call exercises another sampled (sender, receiver, loss) without retrace
    loss2, recv2 = population_game(x, labels)
    jax.block_until_ready((loss2, recv2))
    assert bool(jnp.isfinite(loss2))

    print("KERNEL_OK")
</pallas_src>

<mosaic_0001>
module attributes {stable_mosaic.version = 11 : i64} {
  func.func @_game_kernel(%arg0: i32, %arg1: memref<1xi32, #tpu.memory_space<smem>>, %arg2: memref<8x128xbf16, #tpu.memory_space<vmem>>, %arg3: memref<128x128xbf16, #tpu.memory_space<vmem>>, %arg4: memref<128x128xbf16, #tpu.memory_space<vmem>>, %arg5: memref<8x128xbf16, #tpu.memory_space<vmem>>, %arg6: memref<8x128xf32, #tpu.memory_space<vmem>>, %arg7: memref<8x128xf32, #tpu.memory_space<vmem>>) attributes {dimension_semantics = [#tpu.dimension_semantics<parallel>], iteration_bounds = array<i64: 1>, scalar_prefetch = 1 : i64, scratch_operands = 0 : i64, tpu.core_type = #tpu.core_type<tc>, window_params = [{transform_indices = @transform_0, window_bounds = array<i64: 8, 128>}, {pipeline_mode = #tpu.pipeline_mode<synchronous>, transform_indices = @transform_1, window_bounds = array<i64: 128, 128>}, {pipeline_mode = #tpu.pipeline_mode<synchronous>, transform_indices = @transform_2, window_bounds = array<i64: 128, 128>}, {transform_indices = @transform_3, window_bounds = array<i64: 8, 128>}, {transform_indices = @transform_4, window_bounds = array<i64: 8, 128>}, {transform_indices = @transform_5, window_bounds = array<i64: 8, 128>}]} {
    %c0 = arith.constant 0 : index
    %c0_0 = arith.constant 0 : index
    %0 = vector.load %arg2[%c0, %c0_0] : memref<8x128xbf16, #tpu.memory_space<vmem>>, vector<8x128xbf16>
    %c0_1 = arith.constant 0 : index
    %c0_2 = arith.constant 0 : index
    %1 = vector.load %arg3[%c0_1, %c0_2] : memref<128x128xbf16, #tpu.memory_space<vmem>>, vector<128x128xbf16>
    %cst = arith.constant dense<0.000000e+00> : vector<8x128xf32>
    %2 = tpu.matmul %0, %1, %cst {dimension_numbers = #tpu.dot_dimension_numbers<[1], [0], [0], [1], [0, 0, 1, 1], [], []>} : vector<8x128xbf16>, vector<128x128xbf16>, vector<8x128xf32> -> vector<8x128xf32>
    %3 = arith.truncf %2 : vector<8x128xf32> to vector<8x128xbf16>
    %4 = math.tanh %3 : vector<8x128xbf16>
    %c0_3 = arith.constant 0 : index
    %c0_4 = arith.constant 0 : index
    %5 = vector.load %arg4[%c0_3, %c0_4] : memref<128x128xbf16, #tpu.memory_space<vmem>>, vector<128x128xbf16>
    %cst_5 = arith.constant dense<0.000000e+00> : vector<8x128xf32>
    %6 = tpu.matmul %4, %5, %cst_5 {dimension_numbers = #tpu.dot_dimension_numbers<[1], [0], [0], [1], [0, 0, 1, 1], [], []>} : vector<8x128xbf16>, vector<128x128xbf16>, vector<8x128xf32> -> vector<8x128xf32>
    %c0_6 = arith.constant 0 : index
    %c0_7 = arith.constant 0 : index
    %7 = vector.load %arg6[%c0_6, %c0_7] : memref<8x128xf32, #tpu.memory_space<vmem>>, vector<8x128xf32>
    tpu.vector_store %arg6[%c0_6, %c0_7], %6 {strides = array<i32>} : memref<8x128xf32, #tpu.memory_space<vmem>>, vector<8x128xf32>,
    %c0_8 = arith.constant 0 : index
    %c0_9 = arith.constant 0 : index
    %8 = vector.load %arg5[%c0_8, %c0_9] : memref<8x128xbf16, #tpu.memory_space<vmem>>, vector<8x128xbf16>
    %9 = arith.extf %8 : vector<8x128xbf16> to vector<8x128xf32>
    %10 = arith.subf %6, %9 : vector<8x128xf32>
    %c0_10 = arith.constant 0 : index
    %11 = memref.load %arg1[%c0_10] : memref<1xi32, #tpu.memory_space<smem>>
    %c0_i32 = arith.constant 0 : i32
    %12 = arith.cmpi eq, %11, %c0_i32 : i32
    %13 = arith.extui %12 : i1 to i32
    %c0_i32_11 = arith.constant 0 : i32
    %14 = arith.cmpi ne, %13, %c0_i32_11 : i32
    scf.if %14 {
      %18 = arith.mulf %10, %10 : vector<8x128xf32>
      %19 = vector.shape_cast %18 : vector<8x128xf32> to vector<1x8x128xf32>
      %cst_13 = arith.constant dense<0.000000e+00> : vector<8x128xf32>
      %20 = vector.multi_reduction <add>, %19, %cst_13 [0] : vector<1x8x128xf32> to vector<8x128xf32>
      %c0_14 = arith.constant 0 : index
      %c0_15 = arith.constant 0 : index
      %21 = vector.load %arg7[%c0_14, %c0_15] : memref<8x128xf32, #tpu.memory_space<vmem>>, vector<8x128xf32>
      tpu.vector_store %arg7[%c0_14, %c0_15], %20 {strides = array<i32>} : memref<8x128xf32, #tpu.memory_space<vmem>>, vector<8x128xf32>,
    } else {
    }
    %true = arith.constant true
    %15 = arith.xori %12, %true : i1
    %16 = arith.extui %15 : i1 to i32
    %c0_i32_12 = arith.constant 0 : i32
    %17 = arith.cmpi ne, %16, %c0_i32_12 : i32
    scf.if %17 {
      %18 = math.absf %10 : vector<8x128xf32>
      %19 = vector.shape_cast %18 : vector<8x128xf32> to vector<1x8x128xf32>
      %cst_13 = arith.constant dense<0.000000e+00> : vector<8x128xf32>
      %20 = vector.multi_reduction <add>, %19, %cst_13 [0] : vector<1x8x128xf32> to vector<8x128xf32>
      %c0_14 = arith.constant 0 : index
      %c0_15 = arith.constant 0 : index
      %21 = vector.load %arg7[%c0_14, %c0_15] : memref<8x128xf32, #tpu.memory_space<vmem>>, vector<8x128xf32>
      tpu.vector_store %arg7[%c0_14, %c0_15], %20 {strides = array<i32>} : memref<8x128xf32, #tpu.memory_space<vmem>>, vector<8x128xf32>,
    } else {
    }
    return
  }
  func.func @transform_0(%arg0: i32, %arg1: memref<1xi32, #tpu.memory_space<smem>>) -> (i32, i32) {
    %c0_i32 = arith.constant 0 : i32
    %c0_i32_0 = arith.constant 0 : i32
    return %arg0, %c0_i32 : i32, i32
  }
  func.func @transform_1(%arg0: i32, %arg1: memref<1xi32, #tpu.memory_space<smem>>) -> (i32, i32) {
    %c0_i32 = arith.constant 0 : i32
    %c0_i32_0 = arith.constant 0 : i32
    %c0_i32_1 = arith.constant 0 : i32
    return %c0_i32, %c0_i32_0 : i32, i32
  }
  func.func @transform_2(%arg0: i32, %arg1: memref<1xi32, #tpu.memory_space<smem>>) -> (i32, i32) {
    %c0_i32 = arith.constant 0 : i32
    %c0_i32_0 = arith.constant 0 : i32
    %c0_i32_1 = arith.constant 0 : i32
    return %c0_i32, %c0_i32_0 : i32, i32
  }
  func.func @transform_3(%arg0: i32, %arg1: memref<1xi32, #tpu.memory_space<smem>>) -> (i32, i32) {
    %c0_i32 = arith.constant 0 : i32
    %c0_i32_0 = arith.constant 0 : i32
    return %arg0, %c0_i32 : i32, i32
  }
  func.func @transform_4(%arg0: i32, %arg1: memref<1xi32, #tpu.memory_space<smem>>) -> (i32, i32) {
    %c0_i32 = arith.constant 0 : i32
    %c0_i32_0 = arith.constant 0 : i32
    return %arg0, %c0_i32 : i32, i32
  }
  func.func @transform_5(%arg0: i32, %arg1: memref<1xi32, #tpu.memory_space<smem>>) -> (i32, i32) {
    %c0_i32 = arith.constant 0 : i32
    %c0_i32_0 = arith.constant 0 : i32
    return %arg0, %c0_i32 : i32, i32
  }
}

</mosaic_0001>

<bundles_post_ra>
// kernel: _fused_game.1
= control target key start
LH: loop header
LB: loop body
LE: loop exit
PB: predicated region body
PF: predicated region fallthrough
CT: control target
= control target key end

     0   :  { %13 = vsyncpa [#allocation5], 0  ;;  %s570_s0 = inlined_call_operand.<no memory space> [shape: s32[1], index: 0, kind: input, shape index: {}]   ;;  %s571_s1 = inlined_call_operand.vmem [shape: bf16[8,128], index: 1, kind: input, shape index: {}]   ;;  %s572_s2 = inlined_call_operand.hbm [shape: bf16[128,128], index: 2, kind: input, shape index: {}]   ;;  %s573_s3 = inlined_call_operand.hbm [shape: bf16[128,128], index: 3, kind: input, shape index: {}]   ;;  %s574_s4 = inlined_call_operand.vmem [shape: bf16[8,128], index: 4, kind: input, shape index: {}]   ;;  %s575_s5 = inlined_call_operand.hbm [shape: f32[8,128], index: 5, kind: output, shape index: {0}]   ;;  %s576_s6 = inlined_call_operand.vmem [shape: f32[8,128], index: 6, kind: output, shape index: {1}]  }
   0x1   :  { %14 = vsyncpa [#allocation8], 0 }
   0x2   :  { %15 = vsyncpa [#allocation6], 0  ;;  %s474_s21 = smov [#allocation4]   ;;  %s402_s25 = scalar_lea.hbm %s572_s2, 1024 }
   0x3   :  { %s23_s22 = sshll.u32 %s474_s21, 4  ;;  %p403_p0 = scmp.ne.s32.totalorder %s572_s2, %s402_s25  ;;  %s24_s22 = int_to_ptr.vmem [resolvable:$true] %s23_s22 }
   0x4   :  { %p406_p1 = scmp.lt.u32.totalorder %s402_s25, %s572_s2 }
   0x6   :  { %p408_p2 = pnand %p406_p1, %p403_p0 }
   0x8   :  { %411 = shalt.err (!%p408_p2)
}
   0x9   :  { %s412_s30 = scalar_lea.vmem %s24_s22, 1024  ;;  %p417_p4 = scmp.lt.s32.totalorder %s24_s22, %s24_s22 }
   0xa   :  { %p413_p3 = scmp.ne.s32.totalorder %s24_s22, %s412_s30  ;;  %p418_p5 = scmp.lt.s32.totalorder %s412_s30, %s412_s30 }
   0xc   :  { %p419_p6 = por %p418_p5, %p417_p4 }
   0xe   :  { %p420_p7 = pnand %p419_p6, %p413_p3 }
  0x10   :  { %423 = shalt.err (!%p420_p7)
}
  0x11   :  { %s475_s7 = smov 64   ;;  %s476_s8 = smov 4  }
  0x12   :  { %29 = dma.hbm_to_vmem [thread:$0]  %s572_s2, 1024, %s24_s22, [#allocation5], %s475_s7, %s475_s7, %s476_s8  }
  0x13   :  { %s477_s11 = smov [#allocation7]   ;;  %s424_s15 = scalar_lea.hbm %s573_s3, 1024 }
  0x14   :  { %s35_s12 = sshll.u32 %s477_s11, 4  ;;  %p425_p8 = scmp.ne.s32.totalorder %s573_s3, %s424_s15  ;;  %s36_s12 = int_to_ptr.vmem [resolvable:$true] %s35_s12 }
  0x15   :  { %p428_p9 = scmp.lt.u32.totalorder %s424_s15, %s573_s3 }
  0x17   :  { %p430_p10 = pnand %p428_p9, %p425_p8 }
  0x19   :  { %433 = shalt.err (!%p430_p10)
}
  0x1a   :  { %s434_s20 = scalar_lea.vmem %s36_s12, 1024  ;;  %p439_p12 = scmp.lt.s32.totalorder %s36_s12, %s36_s12 }
  0x1b   :  { %p435_p11 = scmp.ne.s32.totalorder %s36_s12, %s434_s20  ;;  %p440_p13 = scmp.lt.s32.totalorder %s434_s20, %s434_s20 }
  0x1d   :  { %p441_p0 = por %p440_p13, %p439_p12 }
  0x1f   :  { %p442_p1 = pnand %p441_p0, %p435_p11 }
  0x21   :  { %445 = shalt.err (!%p442_p1)
}
  0x22   :  { %41 = dma.hbm_to_vmem [thread:$0]  %s573_s3, 1024, %s36_s12, [#allocation8], %s475_s7, %s475_s7, %s476_s8  }
  0x23   :  { %468 = dma.done.wait [#allocation5], 1024  }
  0x24   :  { %469 = vsyncadd [#allocation5], 4294966272 }
  0x25   :  { %470 = dma.done.wait [#allocation8], 1024  }
  0x26   :  { %471 = vsyncadd [#allocation8], 4294966272  ;;  %v478_v0 = vmov 0.0   ;;  %vm479_vm0 = vmmov 0   ;;  %v384_v1 = vld [vmem:[#allocation4] sm:$0xff]   ;;  %v385_v2 = vld [vmem:[#allocation4 + $0x8] sm:$0xff]  }
  0x27   :  { %337 = vmatprep.subr.bf16.mxu0 %v478_v0  ;;  %353 = vmatprep.mubr.msk.bf16.mxu0 %vm479_vm0, %v478_v0  ;;  %v386_v3 = vld [vmem:[#allocation4 + $0x10] sm:$0xff]   ;;  %v392_v4 = vld [vmem:[#allocation7] sm:$0xff]   ;;  %v387_v5 = vld [vmem:[#allocation4 + $0x18] sm:$0xff]   ;;  %p317_p2 = scmp.ne.s32.totalorder %s570_s0, 0 }
  0x28   :  { %357 = vmatprep.subr.bf16.mxu1 %v478_v0  ;;  %373 = vmatprep.mubr.msk.bf16.mxu1 %vm479_vm0, %v478_v0  ;;  %v393_v6 = vld [vmem:[#allocation7 + $0x8] sm:$0xff]   ;;  %v388_v7 = vld [vmem:[#allocation4 + $0x20] sm:$0xff]   ;;  %v394_v8 = vld [vmem:[#allocation7 + $0x10] sm:$0xff]  }
  0x29   :  { %338 = vmatpush3.bf16.msra.mxu0 %v384_v1  ;;  %358 = vmatpush3.bf16.msra.mxu1 %v392_v4  ;;  %v389_v9 = vld [vmem:[#allocation4 + $0x28] sm:$0xff]   ;;  %v395_v10 = vld [vmem:[#allocation7 + $0x18] sm:$0xff]   ;;  %v390_v11 = vld [vmem:[#allocation4 + $0x30] sm:$0xff]  }
  0x2a   :  { %339 = vmatprep.subr.bf16.mxu0 %v478_v0  ;;  %359 = vmatprep.subr.bf16.mxu1 %v478_v0  ;;  %v391_v12 = vld [vmem:[#allocation4 + $0x38] sm:$0xff]   ;;  %v51_v13 = vld [vmem:[%s571_s1] sm:$0xf]  ;;  %v397_v15 = vld [vmem:[#allocation7 + $0x28] sm:$0xff]  }
  0x2b   :  { %v396_v14 = vld [vmem:[#allocation7 + $0x20] sm:$0xff]   ;;  %v398_v16 = vld [vmem:[#allocation7 + $0x30] sm:$0xff]   ;;  %v399_v17 = vld [vmem:[#allocation7 + $0x38] sm:$0xff]  }
  0x2c   :  { %v263_v24 = vld [vmem:[%s574_s4] sm:$0xf] }
  0x2d   :  { %340 = vmatpush3.bf16.msra.mxu0 %v385_v2  ;;  %360 = vmatpush3.bf16.msra.mxu1 %v393_v6  ;;  %v264_v25 = vunpack.c.l.bf16 %v263_v24 }
  0x2e   :  { %341 = vmatprep.subr.bf16.mxu0 %v478_v0  ;;  %361 = vmatprep.subr.bf16.mxu1 %v478_v0 }
  0x31   :  { %342 = vmatpush3.bf16.msra.mxu0 %v386_v3  ;;  %362 = vmatpush3.bf16.msra.mxu1 %v394_v8 }
  0x32   :  { %343 = vmatprep.subr.bf16.mxu0 %v478_v0  ;;  %363 = vmatprep.subr.bf16.mxu1 %v478_v0 }
  0x35   :  { %344 = vmatpush3.bf16.msra.mxu0 %v387_v5  ;;  %364 = vmatpush3.bf16.msra.mxu1 %v395_v10 }
  0x36   :  { %345 = vmatprep.subr.bf16.mxu0 %v478_v0  ;;  %365 = vmatprep.subr.bf16.mxu1 %v478_v0 }
  0x39   :  { %346 = vmatpush3.bf16.msra.mxu0 %v388_v7  ;;  %366 = vmatpush3.bf16.msra.mxu1 %v396_v14 }
  0x3a   :  { %347 = vmatprep.subr.bf16.mxu0 %v478_v0  ;;  %367 = vmatprep.subr.bf16.mxu1 %v478_v0 }
  0x3d   :  { %348 = vmatpush3.bf16.msra.mxu0 %v389_v9  ;;  %368 = vmatpush3.bf16.msra.mxu1 %v397_v15 }
  0x3e   :  { %349 = vmatprep.subr.bf16.mxu0 %v478_v0  ;;  %369 = vmatprep.subr.bf16.mxu1 %v478_v0 }
  0x41   :  { %350 = vmatpush3.bf16.msra.mxu0 %v390_v11  ;;  %370 = vmatpush3.bf16.msra.mxu1 %v398_v16 }
  0x42   :  { %351 = vmatprep.subr.bf16.mxu0 %v478_v0  ;;  %371 = vmatprep.subr.bf16.mxu1 %v478_v0 }
  0x45   :  { %352 = vmatpush3.bf16.msra.mxu0 %v391_v12  ;;  %372 = vmatpush3.bf16.msra.mxu1 %v399_v17 }
  0x48   :  { %354 = vmatmul.mubr.bf16.vlgmr.msra.gmra.mrb[0].mxu0 %v51_v13 }
 0x11b   :  { %v150_v18 = vpop.f32.mrb[0].mxu0 }
 0x11c   :  { %v156_v19 = vpack.c.bf16 %v150_v18, %v150_v18  ;;  %v355_v20 = vpop.f32.mrb[1].mxu0 }
 0x11d   :  { %v153_v21 = vpop.f32.mrb[2].mxu0 }
 0x11e   :  { %400 = vtanh.bf16 %v156_v19  ;;  %v356_v22 = vpop.f32.mrb[3].mxu0 }
 0x129   :  { %v401_v23 = vpop.eup %400 }
 0x12a   :  { %374 = vmatmul.mubr.bf16.vlgmr.msra.gmra.mrb[0].mxu1 %v401_v23 }
 0x1fa   :  { %270 = sbr.rel (%p317_p2) target bundleno = 515 (0x203), region = 29 }
 0x1fd   :  { %v256_v26 = vpop.f32.mrb[0].mxu1 }
 0x1fe   :  { %262 = vst [vmem:[#allocation9] sm:$0xff] %v256_v26  ;;  %v265_v27 = vsub.f32 %v256_v26, %v264_v25  ;;  %v375_v28 = vpop.f32.mrb[1].mxu1 }
 0x1ff   :  { %v259_v29 = vpop.f32.mrb[2].mxu1 }
 0x200   :  { %v376_v30 = vpop.f32.mrb[3].mxu1  ;;  %v271_v31 = vmul.f32 (!%p317_p2), %v265_v27, %v265_v27 }
 0x202   :  { %273 = vst [vmem:[%s576_s6] sm:$0xff] %v271_v31 }
 0x203 PF:  { %p318_p3 = scmp.eq.s32.totalorder %s570_s0, 0 }
 0x204   :  { %v278_v32 = vand.u32 (!%p318_p3), 2147483647, %v265_v27 }
 0x205   :  { %277 = sbr.rel (%p318_p3) target bundleno = 524 (0x20c), region = 33 }
 0x206   :  { %280 = vst [vmem:[%s576_s6] sm:$0xff] (!%p318_p3), %v278_v32 }
 0x20c PF:  { %s480_s7 = smov [#allocation9]  }
 0x20d   :  { %s287_s8 = sshll.u32 %s480_s7, 4  ;;  %s288_s8 = int_to_ptr.vmem [resolvable:$true] %s287_s8 }
 0x20e   :  { %s446_s9 = scalar_lea.vmem %s288_s8, 128  ;;  %p451_p5 = scmp.lt.s32.totalorder %s288_s8, %s288_s8 }
 0x20f   :  { %p447_p4 = scmp.ne.s32.totalorder %s288_s8, %s446_s9  ;;  %p452_p6 = scmp.lt.s32.totalorder %s446_s9, %s446_s9 }
 0x211   :  { %p453_p7 = por %p452_p6, %p451_p5 }
 0x213   :  { %p454_p8 = pnand %p453_p7, %p447_p4 }
 0x215   :  { %457 = shalt.err (!%p454_p8)
}
 0x216   :  { %s458_s0 = scalar_lea.hbm %s575_s5, 128 }
 0x217   :  { %p459_p9 = scmp.ne.s32.totalorder %s575_s5, %s458_s0  ;;  %p462_p10 = scmp.lt.u32.totalorder %s458_s0, %s575_s5 }
 0x219   :  { %p464_p11 = pnand %p462_p10, %p459_p9 }
 0x21b   :  { %467 = shalt.err (!%p464_p11)
}
 0x21c   :  { %290 = dma.vmem_to_hbm [thread:$0]  %s288_s8, 128, %s575_s5, [#allocation6]  }
 0x21d   :  { %472 = dma.done.wait [#allocation6], 128  }
 0x21e   :  { %473 = vsyncadd [#allocation6], 4294967168 }
 0x21f   :  { %298 = vsyncpa [#allocation5], 1 }
 0x220   :  { %299 = vsyncpa [#allocation8], 1 }
 0x221   :  { %300 = vsyncpa [#allocation6], 1 }

</bundles_post_ra>
